<compile_context>
chip_gen: v6e
topology: v6e:2x2x1
jax: 0.10.0
libtpu: 0.0.40
codegen_flags: <defaults>
</compile_context>

<pallas_src>
import functools

import jax
import jax.numpy as jnp
from jax import lax
from jax.experimental import pallas as pl
from jax.experimental.pallas import tpu as pltpu


# -----------------------------------------------------------------------------
# Kernel
# -----------------------------------------------------------------------------
def residual_block_kernel(x_ref, w1_ref, w2_ref, s1_ref, b1_ref,
                          s2_ref, b2_ref, out_ref, *, B, H, L):
    """One batch block (B images) per grid step.

    x_ref    : (B, H, L)   bf16  lane-dense rows (lane = w*C + c, L = W*C)
    w*_ref   : (3, L, L)   bf16  per-ky banded conv weights (width halo baked in)
    s*/b*_ref: (1, L)      f32   folded BatchNorm scale / bias (tiled over W)
    out_ref  : (B, H, L)   f32
    """
    M = B * H
    x = x_ref[...]                                     # (B, H, L) bf16
    zrow = jnp.zeros((B, 1, L), jnp.bfloat16)

    def conv3x3(img, w_ref):
        # img: (B, H, L) bf16.  Vertical (ky) taps = one-sublane shifts with a
        # zeroed boundary row; horizontal (kx) taps + zero-padding columns are
        # baked into each (L, L) banded weight.  Three accumulating MXU
        # matmuls, bf16 operands, f32 accumulation.
        win0 = jnp.concatenate([zrow, img[:, :H - 1, :]], axis=1)   # reads row y-1
        win2 = jnp.concatenate([img[:, 1:, :], zrow], axis=1)       # reads row y+1
        acc = jnp.dot(win0.reshape(M, L), w_ref[0],
                      preferred_element_type=jnp.float32)
        acc = acc + jnp.dot(img.reshape(M, L), w_ref[1],
                            preferred_element_type=jnp.float32)
        acc = acc + jnp.dot(win2.reshape(M, L), w_ref[2],
                            preferred_element_type=jnp.float32)
        return acc                                     # (M, L) f32

    # conv1 -> bn1 (folded) -> relu; re-pack once to bf16 for conv2.
    h1 = jnp.maximum(conv3x3(x, w1_ref) * s1_ref[...] + b1_ref[...], 0.0)
    h1_bf16 = h1.astype(jnp.bfloat16).reshape(B, H, L)

    # conv2 -> bn2 (folded) -> + residual -> relu   (f32 epilogue everywhere)
    h2 = conv3x3(h1_bf16, w2_ref) * s2_ref[...] + b2_ref[...]
    res = x.astype(jnp.float32).reshape(M, L)          # single f32 cast of x
    out_ref[...] = jnp.maximum(h2 + res, 0.0).reshape(B, H, L).astype(out_ref.dtype)


# -----------------------------------------------------------------------------
# Weight / BN preparation
# -----------------------------------------------------------------------------
def _banded_weights(w_hwio, W):
    """(3, 3, Ci, Co) HWIO conv weight -> (3, W*Ci, W*Co) per-ky banded matrices.

    M[ky, w_in*Ci + ci, x*Co + co] = w[ky, w_in - x + 1, ci, co] when
    |w_in - x| <= 1, else 0.  Out-of-range width taps (the left/right
    padding=1 zero columns) are simply omitted, baking the width halo into
    the weight so activations never need a width pad.
    """
    KH, KW, Ci, Co = w_hwio.shape
    w = w_hwio.astype(jnp.float32)
    mats = []
    for ky in range(KH):
        m = jnp.zeros((W * Ci, W * Co), jnp.float32)
        for kx in range(KW):
            # P[w_in, x] = 1 iff w_in == x + kx - 1  (shifted identity band)
            P = jnp.eye(W, k=1 - kx, dtype=jnp.float32)
            m = m + jnp.kron(P, w[ky, kx])
        mats.append(m)
    return jnp.stack(mats)                             # (3, W*Ci, W*Co)


def _pick_batch_block(N, H, target_rows=256):
    """Largest divisor of N with B_blk*H <= target_rows; keep grid >= 2 if possible."""
    divs = [d for d in range(1, N + 1) if N % d == 0]
    cand = [d for d in divs if d * H <= target_rows] or [1]
    b = max(cand)
    if N // b < 2:
        smaller = [d for d in cand if N // d >= 2]
        if smaller:
            b = max(smaller)
    return b


# -----------------------------------------------------------------------------
# Wrapper
# -----------------------------------------------------------------------------
def residual_block(x_nchw, w1, w2,
                   gamma1, beta1, mean1, var1,
                   gamma2, beta2, mean2, var2,
                   eps=1e-5, out_dtype=jnp.float32):
    """x_nchw: (N, C, H, W);  w*: (Cout, Cin, 3, 3) with Cout == Cin == C."""
    N, C, H, W = x_nchw.shape
    assert w1.shape == (C, C, 3, 3) and w2.shape == (C, C, 3, 3), \
        "this kernel covers stride=1, down_sample=None (i_channel == o_channel)"
    L = W * C

    B_blk = _pick_batch_block(N, H)
    n_steps = N // B_blk

    # NCHW -> lane-dense NHWC rows (N, H, W*C); bf16 operands for the MXU.
    x_rows = (jnp.transpose(x_nchw, (0, 2, 3, 1))
              .reshape(N, H, L).astype(jnp.bfloat16))

    # PyTorch OIHW -> HWIO -> per-ky banded matrices (width halo baked in), bf16.
    w1_mats = _banded_weights(jnp.transpose(w1, (2, 3, 1, 0)), W).astype(jnp.bfloat16)
    w2_mats = _banded_weights(jnp.transpose(w2, (2, 3, 1, 0)), W).astype(jnp.bfloat16)

    # Fold eval-mode BatchNorm into per-channel scale/bias, tiled to the
    # lane-dense row layout (lane index = w*C + c).
    inv1 = (gamma1 / jnp.sqrt(var1 + eps)).astype(jnp.float32)
    inv2 = (gamma2 / jnp.sqrt(var2 + eps)).astype(jnp.float32)
    s1 = jnp.tile(inv1, W).reshape(1, L)
    b1 = jnp.tile((beta1 - mean1 * inv1).astype(jnp.float32), W).reshape(1, L)
    s2 = jnp.tile(inv2, W).reshape(1, L)
    b2 = jnp.tile((beta2 - mean2 * inv2).astype(jnp.float32), W).reshape(1, L)

    kernel = functools.partial(residual_block_kernel, B=B_blk, H=H, L=L)

    out_rows = pl.pallas_call(
        kernel,
        out_shape=jax.ShapeDtypeStruct((N, H, L), out_dtype),
        grid_spec=pltpu.PrefetchScalarGridSpec(
            num_scalar_prefetch=0,
            grid=(n_steps,),
            in_specs=[
                pl.BlockSpec((B_blk, H, L), lambda n: (n, 0, 0)),   # x rows
                pl.BlockSpec((3, L, L), lambda n: (0, 0, 0)),       # w1 (resident)
                pl.BlockSpec((3, L, L), lambda n: (0, 0, 0)),       # w2 (resident)
                pl.BlockSpec((1, L), lambda n: (0, 0)),             # s1
                pl.BlockSpec((1, L), lambda n: (0, 0)),             # b1
                pl.BlockSpec((1, L), lambda n: (0, 0)),             # s2
                pl.BlockSpec((1, L), lambda n: (0, 0)),             # b2
            ],
            out_specs=pl.BlockSpec((B_blk, H, L), lambda n: (n, 0, 0)),
        ),
        compiler_params=pltpu.CompilerParams(
            dimension_semantics=("parallel",)),   # batch blocks independent
    )(x_rows, w1_mats, w2_mats, s1, b1, s2, b2)

    out = out_rows.reshape(N, H, W, C)            # lane-dense rows -> NHWC
    return jnp.transpose(out, (0, 3, 1, 2))       # back to NCHW


# -----------------------------------------------------------------------------
# Pure-JAX reference (eval-mode BatchNorm) for correctness checking.
# -----------------------------------------------------------------------------
def _reference(x, w1, w2, g1, be1, m1, v1, g2, be2, m2, v2, eps=1e-5):
    def conv(inp, w):
        return lax.conv_general_dilated(
            inp, w, window_strides=(1, 1), padding=((1, 1), (1, 1)),
            dimension_numbers=("NCHW", "OIHW", "NCHW"))

    def bn(inp, g, b, m, v):
        return (inp - m[None, :, None, None]) / jnp.sqrt(v + eps)[None, :, None, None] \
            * g[None, :, None, None] + b[None, :, None, None]

    out = jnp.maximum(bn(conv(x, w1), g1, be1, m1, v1), 0.0)
    out = bn(conv(out, w2), g2, be2, m2, v2)
    return jnp.maximum(out + x, 0.0)


if __name__ == "__main__":
    # W * C = 128 -> one full lane tile per row; N=8 exercises batch blocking
    # (B_blk=4 images per grid step, 2 grid steps -> both v7x TCs busy).
    N, C, H, W = 8, 8, 16, 16
    key = jax.random.PRNGKey(0)
    ks = jax.random.split(key, 11)

    x = jax.random.normal(ks[0], (N, C, H, W), jnp.float32)
    w1 = jax.random.normal(ks[1], (C, C, 3, 3), jnp.float32) * 0.1
    w2 = jax.random.normal(ks[2], (C, C, 3, 3), jnp.float32) * 0.1
    gamma1 = jax.random.uniform(ks[3], (C,), jnp.float32, 0.5, 1.5)
    beta1 = jax.random.normal(ks[4], (C,), jnp.float32) * 0.1
    mean1 = jax.random.normal(ks[5], (C,), jnp.float32) * 0.1
    var1 = jax.random.uniform(ks[6], (C,), jnp.float32, 0.5, 1.5)
    gamma2 = jax.random.uniform(ks[7], (C,), jnp.float32, 0.5, 1.5)
    beta2 = jax.random.normal(ks[8], (C,), jnp.float32) * 0.1
    mean2 = jax.random.normal(ks[9], (C,), jnp.float32) * 0.1
    var2 = jax.random.uniform(ks[10], (C,), jnp.float32, 0.5, 1.5)

    out = residual_block(x, w1, w2, gamma1, beta1, mean1, var1,
                         gamma2, beta2, mean2, var2)
    out = jax.block_until_ready(out)

    ref = _reference(x, w1, w2, gamma1, beta1, mean1, var1,
                     gamma2, beta2, mean2, var2)
    assert out.shape == (N, C, H, W)
    # bf16 matmul operands / bf16 intermediate (f32 accumulation) vs an
    # all-f32 reference: allow bf16-level error on O(1..5) activations.
    assert jnp.allclose(out, ref, atol=5e-2, rtol=5e-2), \
        f"max err {jnp.max(jnp.abs(out - ref))}"

    # TODO(synk): training-mode BatchNorm (batch statistics) and the optional
    # down_sample / stride>1 path are not implemented; eval-mode BN is folded.
    print("KERNEL_OK")
</pallas_src>

<mosaic_0001>
module attributes {stable_mosaic.version = 11 : i64} {
  func.func @residual_block_kernel(%arg0: i32, %arg1: memref<4x16x128xbf16, #tpu.memory_space<vmem>>, %arg2: memref<3x128x128xbf16, #tpu.memory_space<vmem>>, %arg3: memref<3x128x128xbf16, #tpu.memory_space<vmem>>, %arg4: memref<1x128xf32, #tpu.memory_space<vmem>>, %arg5: memref<1x128xf32, #tpu.memory_space<vmem>>, %arg6: memref<1x128xf32, #tpu.memory_space<vmem>>, %arg7: memref<1x128xf32, #tpu.memory_space<vmem>>, %arg8: memref<4x16x128xf32, #tpu.memory_space<vmem>>) attributes {dimension_semantics = [#tpu.dimension_semantics<parallel>], iteration_bounds = array<i64: 2>, scalar_prefetch = 0 : i64, scratch_operands = 0 : i64, tpu.core_type = #tpu.core_type<tc>, window_params = [{transform_indices = @transform_0, window_bounds = array<i64: 4, 16, 128>}, {pipeline_mode = #tpu.pipeline_mode<synchronous>, transform_indices = @transform_1, window_bounds = array<i64: 3, 128, 128>}, {pipeline_mode = #tpu.pipeline_mode<synchronous>, transform_indices = @transform_2, window_bounds = array<i64: 3, 128, 128>}, {pipeline_mode = #tpu.pipeline_mode<synchronous>, transform_indices = @transform_3, window_bounds = array<i64: 1, 128>}, {pipeline_mode = #tpu.pipeline_mode<synchronous>, transform_indices = @transform_4, window_bounds = array<i64: 1, 128>}, {pipeline_mode = #tpu.pipeline_mode<synchronous>, transform_indices = @transform_5, window_bounds = array<i64: 1, 128>}, {pipeline_mode = #tpu.pipeline_mode<synchronous>, transform_indices = @transform_6, window_bounds = array<i64: 1, 128>}, {transform_indices = @transform_7, window_bounds = array<i64: 4, 16, 128>}]} {
    %c0 = arith.constant 0 : index
    %c0_0 = arith.constant 0 : index
    %c0_1 = arith.constant 0 : index
    %0 = vector.load %arg1[%c0, %c0_0, %c0_1] : memref<4x16x128xbf16, #tpu.memory_space<vmem>>, vector<4x16x128xbf16>
    %cst = arith.constant 0.000000e+00 : bf16
    %1 = vector.broadcast %cst : bf16 to vector<4x1x128xbf16>
    %2 = vector.extract_strided_slice %0 {offsets = [0, 0, 0], sizes = [4, 15, 128], strides = [1, 1, 1]} : vector<4x16x128xbf16> to vector<4x15x128xbf16>
    %3 = tpu.concatenate %1, %2 in 1 : vector<4x1x128xbf16>, vector<4x15x128xbf16> -> vector<4x16x128xbf16>
    %4 = vector.extract_strided_slice %0 {offsets = [0, 1, 0], sizes = [4, 15, 128], strides = [1, 1, 1]} : vector<4x16x128xbf16> to vector<4x15x128xbf16>
    %5 = tpu.concatenate %4, %1 in 1 : vector<4x15x128xbf16>, vector<4x1x128xbf16> -> vector<4x16x128xbf16>
    %6 = vector.shape_cast %3 : vector<4x16x128xbf16> to vector<64x128xbf16>
    %c0_2 = arith.constant 0 : index
    %c0_3 = arith.constant 0 : index
    %c0_4 = arith.constant 0 : index
    %7 = vector.load %arg2[%c0_2, %c0_3, %c0_4] : memref<3x128x128xbf16, #tpu.memory_space<vmem>>, vector<1x128x128xbf16>
    %8 = vector.shape_cast %7 : vector<1x128x128xbf16> to vector<128x128xbf16>
    %cst_5 = arith.constant dense<0.000000e+00> : vector<64x128xf32>
    %9 = tpu.matmul %6, %8, %cst_5 {dimension_numbers = #tpu.dot_dimension_numbers<[1], [0], [0], [1], [0, 0, 1, 1], [], []>} : vector<64x128xbf16>, vector<128x128xbf16>, vector<64x128xf32> -> vector<64x128xf32>
    %10 = vector.shape_cast %0 : vector<4x16x128xbf16> to vector<64x128xbf16>
    %c1 = arith.constant 1 : index
    %c0_6 = arith.constant 0 : index
    %c0_7 = arith.constant 0 : index
    %11 = vector.load %arg2[%c1, %c0_6, %c0_7] : memref<3x128x128xbf16, #tpu.memory_space<vmem>>, vector<1x128x128xbf16>
    %12 = vector.shape_cast %11 : vector<1x128x128xbf16> to vector<128x128xbf16>
    %cst_8 = arith.constant dense<0.000000e+00> : vector<64x128xf32>
    %13 = tpu.matmul %10, %12, %cst_8 {dimension_numbers = #tpu.dot_dimension_numbers<[1], [0], [0], [1], [0, 0, 1, 1], [], []>} : vector<64x128xbf16>, vector<128x128xbf16>, vector<64x128xf32> -> vector<64x128xf32>
    %14 = arith.addf %9, %13 : vector<64x128xf32>
    %15 = vector.shape_cast %5 : vector<4x16x128xbf16> to vector<64x128xbf16>
    %c2 = arith.constant 2 : index
    %c0_9 = arith.constant 0 : index
    %c0_10 = arith.constant 0 : index
    %16 = vector.load %arg2[%c2, %c0_9, %c0_10] : memref<3x128x128xbf16, #tpu.memory_space<vmem>>, vector<1x128x128xbf16>
    %17 = vector.shape_cast %16 : vector<1x128x128xbf16> to vector<128x128xbf16>
    %cst_11 = arith.constant dense<0.000000e+00> : vector<64x128xf32>
    %18 = tpu.matmul %15, %17, %cst_11 {dimension_numbers = #tpu.dot_dimension_numbers<[1], [0], [0], [1], [0, 0, 1, 1], [], []>} : vector<64x128xbf16>, vector<128x128xbf16>, vector<64x128xf32> -> vector<64x128xf32>
    %19 = arith.addf %14, %18 : vector<64x128xf32>
    %c0_12 = arith.constant 0 : index
    %c0_13 = arith.constant 0 : index
    %20 = vector.load %arg4[%c0_12, %c0_13] : memref<1x128xf32, #tpu.memory_space<vmem>>, vector<1x128xf32>
    %21 = vector.broadcast %20 : vector<1x128xf32> to vector<64x128xf32>
    %22 = arith.mulf %19, %21 : vector<64x128xf32>
    %c0_14 = arith.constant 0 : index
    %c0_15 = arith.constant 0 : index
    %23 = vector.load %arg5[%c0_14, %c0_15] : memref<1x128xf32, #tpu.memory_space<vmem>>, vector<1x128xf32>
    %24 = vector.broadcast %23 : vector<1x128xf32> to vector<64x128xf32>
    %25 = arith.addf %22, %24 : vector<64x128xf32>
    %cst_16 = arith.constant 0.000000e+00 : f32
    %26 = vector.broadcast %cst_16 : f32 to vector<64x128xf32>
    %27 = arith.maximumf %25, %26 : vector<64x128xf32>
    %28 = arith.truncf %27 : vector<64x128xf32> to vector<64x128xbf16>
    %29 = vector.shape_cast %28 : vector<64x128xbf16> to vector<4x16x128xbf16>
    %30 = vector.extract_strided_slice %29 {offsets = [0, 0, 0], sizes = [4, 15, 128], strides = [1, 1, 1]} : vector<4x16x128xbf16> to vector<4x15x128xbf16>
    %31 = tpu.concatenate %1, %30 in 1 : vector<4x1x128xbf16>, vector<4x15x128xbf16> -> vector<4x16x128xbf16>
    %32 = vector.extract_strided_slice %29 {offsets = [0, 1, 0], sizes = [4, 15, 128], strides = [1, 1, 1]} : vector<4x16x128xbf16> to vector<4x15x128xbf16>
    %33 = tpu.concatenate %32, %1 in 1 : vector<4x15x128xbf16>, vector<4x1x128xbf16> -> vector<4x16x128xbf16>
    %34 = vector.shape_cast %31 : vector<4x16x128xbf16> to vector<64x128xbf16>
    %c0_17 = arith.constant 0 : index
    %c0_18 = arith.constant 0 : index
    %c0_19 = arith.constant 0 : index
    %35 = vector.load %arg3[%c0_17, %c0_18, %c0_19] : memref<3x128x128xbf16, #tpu.memory_space<vmem>>, vector<1x128x128xbf16>
    %36 = vector.shape_cast %35 : vector<1x128x128xbf16> to vector<128x128xbf16>
    %cst_20 = arith.constant dense<0.000000e+00> : vector<64x128xf32>
    %37 = tpu.matmul %34, %36, %cst_20 {dimension_numbers = #tpu.dot_dimension_numbers<[1], [0], [0], [1], [0, 0, 1, 1], [], []>} : vector<64x128xbf16>, vector<128x128xbf16>, vector<64x128xf32> -> vector<64x128xf32>
    %38 = vector.shape_cast %29 : vector<4x16x128xbf16> to vector<64x128xbf16>
    %c1_21 = arith.constant 1 : index
    %c0_22 = arith.constant 0 : index
    %c0_23 = arith.constant 0 : index
    %39 = vector.load %arg3[%c1_21, %c0_22, %c0_23] : memref<3x128x128xbf16, #tpu.memory_space<vmem>>, vector<1x128x128xbf16>
    %40 = vector.shape_cast %39 : vector<1x128x128xbf16> to vector<128x128xbf16>
    %cst_24 = arith.constant dense<0.000000e+00> : vector<64x128xf32>
    %41 = tpu.matmul %38, %40, %cst_24 {dimension_numbers = #tpu.dot_dimension_numbers<[1], [0], [0], [1], [0, 0, 1, 1], [], []>} : vector<64x128xbf16>, vector<128x128xbf16>, vector<64x128xf32> -> vector<64x128xf32>
    %42 = arith.addf %37, %41 : vector<64x128xf32>
    %43 = vector.shape_cast %33 : vector<4x16x128xbf16> to vector<64x128xbf16>
    %c2_25 = arith.constant 2 : index
    %c0_26 = arith.constant 0 : index
    %c0_27 = arith.constant 0 : index
    %44 = vector.load %arg3[%c2_25, %c0_26, %c0_27] : memref<3x128x128xbf16, #tpu.memory_space<vmem>>, vector<1x128x128xbf16>
    %45 = vector.shape_cast %44 : vector<1x128x128xbf16> to vector<128x128xbf16>
    %cst_28 = arith.constant dense<0.000000e+00> : vector<64x128xf32>
    %46 = tpu.matmul %43, %45, %cst_28 {dimension_numbers = #tpu.dot_dimension_numbers<[1], [0], [0], [1], [0, 0, 1, 1], [], []>} : vector<64x128xbf16>, vector<128x128xbf16>, vector<64x128xf32> -> vector<64x128xf32>
    %47 = arith.addf %42, %46 : vector<64x128xf32>
    %c0_29 = arith.constant 0 : index
    %c0_30 = arith.constant 0 : index
    %48 = vector.load %arg6[%c0_29, %c0_30] : memref<1x128xf32, #tpu.memory_space<vmem>>, vector<1x128xf32>
    %49 = vector.broadcast %48 : vector<1x128xf32> to vector<64x128xf32>
    %50 = arith.mulf %47, %49 : vector<64x128xf32>
    %c0_31 = arith.constant 0 : index
    %c0_32 = arith.constant 0 : index
    %51 = vector.load %arg7[%c0_31, %c0_32] : memref<1x128xf32, #tpu.memory_space<vmem>>, vector<1x128xf32>
    %52 = vector.broadcast %51 : vector<1x128xf32> to vector<64x128xf32>
    %53 = arith.addf %50, %52 : vector<64x128xf32>
    %54 = arith.extf %0 : vector<4x16x128xbf16> to vector<4x16x128xf32>
    %55 = vector.shape_cast %54 : vector<4x16x128xf32> to vector<64x128xf32>
    %56 = arith.addf %53, %55 : vector<64x128xf32>
    %cst_33 = arith.constant 0.000000e+00 : f32
    %57 = vector.broadcast %cst_33 : f32 to vector<64x128xf32>
    %58 = arith.maximumf %56, %57 : vector<64x128xf32>
    %59 = vector.shape_cast %58 : vector<64x128xf32> to vector<4x16x128xf32>
    %c0_34 = arith.constant 0 : index
    %c0_35 = arith.constant 0 : index
    %c0_36 = arith.constant 0 : index
    %60 = vector.load %arg8[%c0_34, %c0_35, %c0_36] : memref<4x16x128xf32, #tpu.memory_space<vmem>>, vector<4x16x128xf32>
    tpu.vector_store %arg8[%c0_34, %c0_35, %c0_36], %59 {strides = array<i32>} : memref<4x16x128xf32, #tpu.memory_space<vmem>>, vector<4x16x128xf32>,
    return
  }
  func.func @transform_0(%arg0: i32) -> (i32, i32, i32) {
    %c0_i32 = arith.constant 0 : i32
    %c0_i32_0 = arith.constant 0 : i32
    %c0_i32_1 = arith.constant 0 : i32
    return %arg0, %c0_i32, %c0_i32_0 : i32, i32, i32
  }
  func.func @transform_1(%arg0: i32) -> (i32, i32, i32) {
    %c0_i32 = arith.constant 0 : i32
    %c0_i32_0 = arith.constant 0 : i32
    %c0_i32_1 = arith.constant 0 : i32
    %c0_i32_2 = arith.constant 0 : i32
    return %c0_i32, %c0_i32_0, %c0_i32_1 : i32, i32, i32
  }
  func.func @transform_2(%arg0: i32) -> (i32, i32, i32) {
    %c0_i32 = arith.constant 0 : i32
    %c0_i32_0 = arith.constant 0 : i32
    %c0_i32_1 = arith.constant 0 : i32
    %c0_i32_2 = arith.constant 0 : i32
    return %c0_i32, %c0_i32_0, %c0_i32_1 : i32, i32, i32
  }
  func.func @transform_3(%arg0: i32) -> (i32, i32) {
    %c0_i32 = arith.constant 0 : i32
    %c0_i32_0 = arith.constant 0 : i32
    %c0_i32_1 = arith.constant 0 : i32
    return %c0_i32, %c0_i32_0 : i32, i32
  }
  func.func @transform_4(%arg0: i32) -> (i32, i32) {
    %c0_i32 = arith.constant 0 : i32
    %c0_i32_0 = arith.constant 0 : i32
    %c0_i32_1 = arith.constant 0 : i32
    return %c0_i32, %c0_i32_0 : i32, i32
  }
  func.func @transform_5(%arg0: i32) -> (i32, i32) {
    %c0_i32 = arith.constant 0 : i32
    %c0_i32_0 = arith.constant 0 : i32
    %c0_i32_1 = arith.constant 0 : i32
    return %c0_i32, %c0_i32_0 : i32, i32
  }
  func.func @transform_6(%arg0: i32) -> (i32, i32) {
    %c0_i32 = arith.constant 0 : i32
    %c0_i32_0 = arith.constant 0 : i32
    %c0_i32_1 = arith.constant 0 : i32
    return %c0_i32, %c0_i32_0 : i32, i32
  }
  func.func @transform_7(%arg0: i32) -> (i32, i32, i32) {
    %c0_i32 = arith.constant 0 : i32
    %c0_i32_0 = arith.constant 0 : i32
    %c0_i32_1 = arith.constant 0 : i32
    return %arg0, %c0_i32, %c0_i32_0 : i32, i32, i32
  }
}

</mosaic_0001>

<bundles_post_ra>
// kernel: tpu_custom_call.1
= control target key start
LH: loop header
LB: loop body
LE: loop exit
PB: predicated region body
PF: predicated region fallthrough
CT: control target
= control target key end

     0   :  { %s2431_s0 = inlined_call_operand.hbm [shape: bf16[8,16,128], index: 0, kind: input, shape index: {}]   ;;  %s2432_s1 = inlined_call_operand.hbm [shape: bf16[3,128,128], index: 1, kind: input, shape index: {}]   ;;  %s2433_s2 = inlined_call_operand.hbm [shape: bf16[3,128,128], index: 2, kind: input, shape index: {}]   ;;  %s2434_s3 = inlined_call_operand.vmem [shape: f32[1,128], index: 3, kind: input, shape index: {}]   ;;  %s2435_s4 = inlined_call_operand.vmem [shape: f32[1,128], index: 4, kind: input, shape index: {}]   ;;  %s2436_s5 = inlined_call_operand.vmem [shape: f32[1,128], index: 5, kind: input, shape index: {}]   ;;  %s2437_s6 = inlined_call_operand.vmem [shape: f32[1,128], index: 6, kind: input, shape index: {}]   ;;  %s2438_s7 = inlined_call_operand.hbm [shape: f32[8,16,128], index: 7, kind: output, shape index: {}]  }
   0x1   :  { %2445 = sst [smem:[#allocation12_spill]] %s2432_s1 }
   0x2   :  { %12 = vsyncpa [#allocation3], 0 }
   0x3   :  { %14 = vsyncpa [#allocation3 + $0x1], 0 }
   0x4   :  { %15 = vsyncpa [#allocation6], 0 }
   0x5   :  { %16 = vsyncpa [#allocation4], 0 }
   0x6   :  { %18 = vsyncpa [#allocation4 + $0x1], 0  ;;  %s2098_s24 = smov 0   ;;  %s2100_s25 = smov 0  }
   0x7   :  { %s2102_s26 = smov 0   ;;  %s2104_s27 = smov 0  }
   0x8 LB: > { %s2119_s28 = sadd.s32 4294967295, %s2048_s27   ;;  %s1477_s29 = sadd.s32 4294967294, %s2048_s27   ;;  %s2048_s27 = sphi %s2104_s27, %s2469_s27   ;;  %s2044_s26 = sphi %s2102_s26, %s2468_s26   ;;  %s2040_s25 = sphi %s2100_s25, %s2467_s25   ;;  %s2036_s24 = sphi %s2098_s24, %s2466_s24  }
   0x9   : > { %p44_p0 = scmp.ne.s32.totalorder %s2040_s25, %s2036_s24  ;;  %p2440_p1 = scmp.eq.s32.totalorder %s2119_s28, 0 }
   0xa   : > { %p194_p2 = scmp.eq.s32.totalorder %s2119_s28, 1  ;;  %p200_p3 = scmp.eq.s32.totalorder %s1477_s29, 1 }
   0xb   : > { %p2128_p4 = por %p2440_p1, %p44_p0  ;;  %p1478_p5 = scmp.ge.s32.totalorder %s2048_s27, 1 }
   0xc   : > { %p2133_p6 = por %p200_p3, %p44_p0  ;;  %p207_p7 = scmp.lt.s32.totalorder %s2048_s27, 3 }
   0xd   : > { %s2446_s30 = scalar_select %p2128_p4, 1, 0 }
   0xe   : > { %s2447_s8 = scalar_select %p2133_p6, 1, 0 }
   0xf   : > { %p2138_p8 = pnand %p1478_p5, %p207_p7  ;;  %s2050_s10 = smov [#allocation5]  }
  0x10   : > { %s219_s11 = sshll.u32 %s2050_s10, 4  ;;  %s2051_s13 = smov [#allocation7]   ;;  %s220_s11 = int_to_ptr.vmem [resolvable:$true] %s219_s11 }
  0x11   : > { %s2448_s9 = scalar_select %p2138_p8, 1, 0 }
  0x12   : > { %p1785_p9 = pneg %p2138_p8  ;;  %s232_s14 = sshll.u32 %s2051_s13, 4  ;;  %s233_s14 = int_to_ptr.vmem [resolvable:$true] %s232_s14 }
  0x13   : > { %s1911_s15 = scalar_lea.vmem %s220_s11, 3072  ;;  %p1919_p5 = scmp.lt.s32.totalorder %s220_s11, %s220_s11 }
  0x14   : > { %p2147_p11 = pnand %p1785_p9, %p2440_p1  ;;  %p1912_p13 = scmp.ne.s32.totalorder %s220_s11, %s1911_s15 }
  0x15   : > { %p1920_p7 = scmp.lt.s32.totalorder %s1911_s15, %s1911_s15 }
  0x16   : > { %p1902_p12 = pneg %p2147_p11 }
  0x17   : > { %p1921_p10 = por %p1920_p7, %p1919_p5 }
  0x18   : > { %p1914_p0 = pnand %p1912_p13, %p1902_p12 }
  0x1a   : > { %p1915_p3 = pneg %p1914_p0 }
  0x1c   : > { %p1922_p9 = pnand %p1921_p10, %p1915_p3 }
  0x1e   : > { %1925 = shalt.err (!%p1922_p9)
}
  0x1f   : > { %s2439_s16 = smov 64   ;;  %s2441_s17 = smov 4  }
  0x20   : > { %s2450_s1 = sld [smem:[#allocation12_spill]]  ;;  %s1937_s20 = scalar_lea.vmem %s233_s14, 3072 }
  0x21   : > { %p1938_p13 = scmp.ne.s32.totalorder %s233_s14, %s1937_s20  ;;  %p1945_p10 = scmp.lt.s32.totalorder %s233_s14, %s233_s14 }
  0x22   : > { %p1946_p3 = scmp.lt.s32.totalorder %s1937_s20, %s1937_s20 }
  0x23   : > { %p1940_p0 = pnand %p1938_p13, %p1902_p12 }
  0x24   : > { %p1947_p7 = por %p1946_p3, %p1945_p10 }
  0x25   : > { %p1941_p5 = pneg %p1940_p0 }
  0x26   : > { %1788 = dma.hbm_to_vmem [thread:$0]  (!%p2147_p11), %s2450_s1, 3072, %s220_s11, [#allocation6], %s2439_s16, %s2439_s16, %s2441_s17  }
  0x27   : > { %p1948_p9 = pnand %p1947_p7, %p1941_p5 }
  0x29   : > { %1951 = shalt.err (!%p1948_p9)
}
  0x2a   : > { %1791 = dma.hbm_to_vmem [thread:$0]  (!%p2147_p11), %s2433_s2, 3072, %s233_s14, [#allocation6], %s2439_s16, %s2439_s16, %s2441_s17  }
  0x2b   : > { %s2176_s23 = sadd.s32 1, %s2048_s27   ;;  %s31_s29 = sadd.s32 1, %s2044_s26 }
  0x2c   : > { %s28_s10 = ssub.s32 %s2048_s27, %s2176_s23  ;;  %p38_p12 = scmp.ne.s32.totalorder %s2044_s26, %s2040_s25 }
  0x2d   : > { %p29_p13 = scmp.eq.s32.totalorder %s28_s10, 0  ;;  %p39_p0 = scmp.eq.s32.totalorder %s2048_s27, 0 }
  0x2e   : > { %p2186_p5 = por %p194_p2, %p38_p12  ;;  %p1802_p10 = scmp.lt.s32.totalorder %s2048_s27, 2 }
  0x2f   : > { %s2192_s12 = scalar_select %p29_p13, %s2044_s26, %s31_s29  }
  0x30   : > { %s2451_s11 = scalar_select %p2186_p5, 1, 0 }
  0x31   : > { %p40_p3 = por %p39_p0, %p38_p12  ;;  %s258_s13 = sand.u32 1, %s2044_s26  }
  0x32   : > { %s1482_s15 = sshll.u32 %s258_s13, 5  ;;  %s1554_s14 = sshll.u32 %s2048_s27, 9 }
  0x33   : > { %s2199_s20 = scalar_lea.hbm %s2431_s0, %s1554_s14  ;;  %s262_s21 = scalar_lea.vmem [#allocation2], %s1482_s15 }
  0x34   : > { %s270_s22 = sshll.u32 %s262_s21, 4  ;;  %p2203_p2 = pnand %p1802_p10, %p40_p3  ;;  %s2201_s22 = int_to_ptr.vmem [resolvable:$true] %s270_s22 }
  0x35   : > { %s2207_s29 = scalar_lea.sflag [#allocation3], %s258_s13  ;;  %s1952_s16 = scalar_lea.hbm %s2199_s20, 512 }
  0x36   : > { %p1953_p11 = scmp.ne.s32.totalorder %s2199_s20, %s1952_s16  ;;  %p1954_p7 = pneg %p2203_p2 }
  0x37   : > { %s1957_s15 = scalar_lea.hbm %s2431_s0, 1024  ;;  %p1958_p13 = scmp.lt.s32.totalorder %s2199_s20, %s2431_s0 }
  0x38   : > { %p1955_p9 = pnand %p1954_p7, %p1953_p11  ;;  %p1959_p0 = scmp.lt.s32.totalorder %s1957_s15, %s1952_s16 }
  0x3a   : > { %p1956_p12 = pneg %p1955_p9  ;;  %p1960_p10 = por %p1959_p0, %p1958_p13 }
  0x3c   : > { %p1961_p3 = pnand %p1960_p10, %p1956_p12 }
  0x3e   : > { %1964 = shalt.err (!%p1961_p3)
}
  0x3f   : > { %s1965_s13 = scalar_lea.vmem %s2201_s22, 512  ;;  %s2054_s17 = smov [#allocation2]  }
  0x40   : > { %p1966_p1 = scmp.ne.s32.totalorder %s2201_s22, %s1965_s13  ;;  %s1970_s1 = sshll.u32 %s2054_s17, 4  ;;  %s1971_s1 = int_to_ptr.vmem [resolvable:$false] %s1970_s1 }
  0x41   : > { %s1972_s14 = scalar_lea.vmem %s1971_s1, 1024  ;;  %p1973_p9 = scmp.lt.s32.totalorder %s2201_s22, %s1971_s1 }
  0x42   : > { %p1968_p6 = pnand %p1966_p1, %p1954_p7  ;;  %p1974_p5 = scmp.lt.s32.totalorder %s1972_s14, %s1965_s13 }
  0x44   : > { %p1969_p11 = pneg %p1968_p6  ;;  %p1975_p4 = por %p1974_p5, %p1973_p9 }
  0x46   : > { %p1976_p8 = pnand %p1975_p4, %p1969_p11 }
  0x48   : > { %1979 = shalt.err (!%p1976_p8)
}
  0x49   : > { %s2453_s16 = smov 4   ;;  %s2454_s18 = smov 64  }
  0x4a   : > { %1795 = dma.hbm_to_vmem [thread:$0]  (!%p2203_p2), %s2199_s20, 512, %s2201_s22, %s2207_s29, %s2454_s18, %s2454_s18, %s2453_s16  }
  0x4b   : > { %p2455_p1 = scmp.ne.s32.totalorder %s2448_s9, 0 }
  0x4c   : > { %s2234_s17 = sand.u32 (!%p2455_p1), 1, %s2040_s25   ;;  %p2456_p4 = scmp.ne.s32.totalorder (!%p2455_p1), %s2446_s30, 0 }
  0x4d   : > { %282 = sbr.rel (%p2455_p1) target bundleno = 624 (0x270), region = 48  ;;  %s1487_s1 = sshll.u32 (!%p2455_p1), %s2234_s17, 5 }
  0x4e   : > { %s285_s15 = scalar_lea.sflag (!%p2455_p1), [#allocation3], %s2234_s17  ;;  %s2238_s19 = scalar_lea.vmem (!%p2455_p1), [#allocation2], %s1487_s1 }
  0x52   : > { %2023 = dma.done.wait (%p2456_p4), %s285_s15, 512  }
  0x53   : > { %2025 = vsyncadd (%p2456_p4), %s285_s15, 4294966784  ;;  %p2457_p6 = scmp.eq.s32.totalorder %s2119_s28, 0 }
  0x55   : > { %2027 = dma.done.wait (%p2457_p6), [#allocation6], 6144   ;;  %p2458_p8 = pmov %p2457_p6 }
  0x56   : > { %v1844_v0 = vld [vmem:[#allocation5 + $0x78] sm:$0xff]   ;;  %v1846_v2 = vld [vmem:[#allocation5 + $0x70] sm:$0xff]   ;;  %v1848_v4 = vld [vmem:[#allocation5 + $0x68] sm:$0xff]   ;;  %vm391_vm0 = vsmask.f32 256  ;;  %vm390_vm1 = vcmask 1040384  }
  0x57   : > { %2029 = vsyncadd (%p2458_p8), [#allocation6], 4294961152  ;;  %v1845_v1 = vld [vmem:[#allocation5 + $0x38] sm:$0xff]   ;;  %1629 = vmatprep.subr.bf16.mxu0 %v1844_v0  ;;  %v1847_v3 = vld [vmem:[#allocation5 + $0x30] sm:$0xff]   ;;  %vm409_vm3 = vcmask 1047552   ;;  %s1490_s14 = sshll.u32 %s2234_s17, 6 }
  0x58   : > { %1653 = vmatprep.subr.bf16.mxu1 %v1845_v1  ;;  %1630 = vmatpush3.bf16.msra.mxu0 %v1844_v0  ;;  %v1849_v5 = vld [vmem:[#allocation5 + $0x28] sm:$0xff]   ;;  %v1850_v6 = vld [vmem:[#allocation5 + $0x60] sm:$0xff]   ;;  %v1852_v8 = vld [vmem:[#allocation5 + $0x58] sm:$0xff]   ;;  %vm410_vm4 = vsmask.f32 7424  ;;  %s2358_s16 = scalar_lea.vmem [#allocation8], %s1490_s14 }
  0x59   : > { %1654 = vmatpush3.bf16.msra.mxu1 %v1845_v1  ;;  %1631 = vmatprep.subr.bf16.mxu0 %v1846_v2  ;;  %v1851_v7 = vld [vmem:[#allocation5 + $0x20] sm:$0xff]   ;;  %v1853_v9 = vld [vmem:[#allocation5 + $0x18] sm:$0xff]   ;;  %v1854_v10 = vld [vmem:[#allocation5 + $0x50] sm:$0xff]   ;;  %s1556_s18 = sshll.u32 %s2119_s28, 10  ;;  %s1385_s1 = sshll.u32 %s2358_s16, 4  ;;  %s2386_s1 = int_to_ptr.vmem [resolvable:$true] %s1385_s1 }
  0x5a   : > { %1655 = vmatprep.subr.bf16.mxu1 %v1847_v3  ;;  %v2249_v11 = vld [vmem:[%s2238_s19] sm:$0xff]   ;;  %v2252_v12 = vld [vmem:[%s2238_s19 + $0x8] sm:$0xff]   ;;  %v1855_v13 = vld [vmem:[#allocation5 + $0x10] sm:$0xff]   ;;  %s2384_s30 = scalar_lea.hbm %s2438_s7, %s1556_s18  ;;  %s1371_s9 = scalar_lea.sflag [#allocation4], %s2234_s17 }
  0x5b   : > { %1645 = vmatprep.mubr.bf16.mxu0 %v2249_v11  ;;  %v359_v14 = vshrl.u32 %v2249_v11, 16  ;;  %v362_v15 = vshll.u32 %v2249_v11, 16  ;;  %v366_v16 = vshrl.u32 %v2252_v12, 16  ;;  %v1856_v17 = vld [vmem:[#allocation5 + $0x48] sm:$0xff]   ;;  %vm2258_vm2 = vmand %vm390_vm1, %vm391_vm0  ;;  %v369_v22 = vshll.u32 %v2252_v12, 16  ;;  %v2266_v23 = vld [vmem:[%s2238_s19 + $0x10] sm:$0xff]  }
  0x5c   : > { %1632 = vmatpush3.bf16.msra.mxu0 %v1846_v2  ;;  %v1857_v18 = vld [vmem:[#allocation5 + $0x8] sm:$0xff]   ;;  %v2269_v25 = vld [vmem:[%s2238_s19 + $0x18] sm:$0xff]   ;;  %v1858_v27 = vld [vmem:[#allocation5 + $0x40] sm:$0xff]   ;;  %v373_v30 = vshrl.u32 %v2266_v23, 16  ;;  %v376_v31 = vshll.u32 %v2266_v23, 16  ;;  %s1980_s28 = scalar_lea.vmem %s2386_s1, 1024 }
  0x5d   : > { %1656 = vmatpush3.bf16.msra.mxu1 %v1847_v3  ;;  %1633 = vmatprep.subr.bf16.mxu0 %v1848_v4  ;;  %v361_v19 = vrot.slane %v359_v14, 7  ;;  %v368_v21 = vrot.slane %v366_v16, 7  ;;  %v397_v26 = vrot.slane %v362_v15, 1  ;;  %v1859_v28 = vld [vmem:[#allocation5] sm:$0xff]   ;;  %v380_v32 = vshrl.u32 %v2269_v25, 16  ;;  %v1862_v37 = vld [vmem:[#allocation5 + $0xb8] sm:$0xff]   ;;  %vm2278_vm5 = vmand %vm409_vm3, %vm410_vm4  ;;  %p1981_p5 = scmp.ne.s32.totalorder %s2386_s1, %s1980_s28 }
  0x5e   : > { %1657 = vmatprep.subr.bf16.mxu1 %v1849_v5  ;;  %v383_v33 = vshll.u32 %v2269_v25, 16  ;;  %v375_v35 = vrot.slane %v373_v30, 7  ;;  %v1863_v41 = vld [vmem:[#allocation5 + $0xb0] sm:$0xff]   ;;  %v1864_v47 = vld [vmem:[#allocation5 + $0xa8] sm:$0xff]   ;;  %v1865_v48 = vld [vmem:[#allocation5 + $0xa0] sm:$0xff]   ;;  %v399_v52 = vrot.slane %v369_v22, 1 }
  0x5f   : > { %v364_v24 = vor.u32 %v362_v15, %v361_v19  ;;  %v371_v34 = vor.u32 %v369_v22, %v368_v21  ;;  %v398_v36 = vor.u32 %v397_v26, %v359_v14  ;;  %v382_v38 = vrot.slane %v380_v32, 7  ;;  %v1866_v49 = vld [vmem:[#allocation5 + $0x98] sm:$0xff]   ;;  %v1869_v50 = vld [vmem:[#allocation5 + $0x90] sm:$0xff]   ;;  %v1870_v51 = vld [vmem:[#allocation5 + $0x88] sm:$0xff]   ;;  %p2463_p2 = scmp.ne.s32.totalorder %s2451_s11, 0  ;;  %s2055_s20 = smov [#allocation8]  }
  0x60   : > { %1634 = vmatpush3.bf16.msra.mxu0 %v1848_v4  ;;  %v378_v40 = vor.u32 %v376_v31, %v375_v35  ;;  %v1871_v53 = vld [vmem:[#allocation5 + $0x80] sm:$0xff]   ;;  %v401_v54 = vrot.slane %v376_v31, 1  ;;  %v400_v55 = vor.u32 %v399_v52, %v366_v16  ;;  %v403_v58 = vrot.slane %v383_v33, 1  ;;  %v1872_v62 = vld [vmem:[#allocation7 + $0x78] sm:$0xff]   ;;  %v1873_v63 = vld [vmem:[#allocation7 + $0x70] sm:$0xff]   ;;  %s1984_s22 = sshll.u32 %s2055_s20, 4  ;;  %s1985_s22 = int_to_ptr.vmem [resolvable:$false] %s1984_s22 }
  0x61   : > { %1658 = vmatpush3.bf16.msra.mxu1 %v1849_v5  ;;  %1635 = vmatprep.subr.bf16.mxu0 %v1850_v6  ;;  %v393_v29 = vsel %vm2258_vm2, 0, %v364_v24  ;;  %v385_v42 = vor.u32 %v383_v33, %v382_v38  ;;  %v394_v43 = vsel %vm2258_vm2, 0, %v371_v34  ;;  %v412_v44 = vsel %vm2278_vm5, %v398_v36, 0  ;;  %v1874_v0 = vld [vmem:[#allocation7 + $0x68] sm:$0xff]   ;;  %v1875_v1 = vld [vmem:[#allocation7 + $0x38] sm:$0xff]   ;;  %v1876_v2 = vld [vmem:[#allocation7 + $0x60] sm:$0xff]   ;;  %p1982_p7 = pnand %p1981_p5, %p2463_p2  ;;  %p1987_p13 = scmp.lt.s32.totalorder %s2386_s1, %s1985_s22 }
  0x62   : > { %1659 = vmatprep.subr.bf16.mxu1 %v1851_v7  ;;  %1669 = vmatprep.mubr.bf16.mxu1 %v393_v29  ;;  %v395_v45 = vsel %vm2258_vm2, 0, %v378_v40  ;;  %v402_v56 = vor.u32 %v401_v54, %v373_v30  ;;  %v413_v57 = vsel %vm2278_vm5, %v400_v55, 0  ;;  %v404_v60 = vor.u32 %v403_v58, %v380_v32  ;;  %v1877_v3 = vld [vmem:[#allocation7 + $0x30] sm:$0xff]   ;;  %v1878_v4 = vld [vmem:[#allocation7 + $0x58] sm:$0xff]   ;;  %v1879_v5 = vld [vmem:[#allocation7 + $0x28] sm:$0xff]   ;;  %s1986_s10 = scalar_lea.vmem %s1985_s22, 2048 }
  0x63   : > { %v396_v46 = vsel %vm2258_vm2, 0, %v385_v42  ;;  %v1886_v14 = vld [vmem:[#allocation7 + $0x8] sm:$0xff]   ;;  %v2301_v15 = vld [vmem:[#allocation7 + $0xb8] sm:$0xff]   ;;  %v1888_v16 = vld [vmem:[#allocation7] sm:$0xff]   ;;  %p1983_p12 = pneg %p1982_p7  ;;  %p1988_p0 = scmp.lt.s32.totalorder %s1986_s10, %s1980_s28 }
  0x64   : > { %1636 = vmatpush3.bf16.msra.mxu0 %v1850_v6  ;;  %v414_v59 = vsel %vm2278_vm5, %v402_v56, 0  ;;  %v415_v61 = vsel %vm2278_vm5, %v404_v60, 0  ;;  %v1880_v6 = vld [vmem:[#allocation7 + $0x50] sm:$0xff]   ;;  %v1519_v35 = vld [vmem:[%s2434_s3] ss:$0 sm:$0xff] }
  0x65   : > { %1660 = vmatpush3.bf16.msra.mxu1 %v1851_v7  ;;  %1637 = vmatprep.subr.bf16.mxu0 %v1852_v8  ;;  %v1881_v7 = vld [vmem:[#allocation7 + $0x20] sm:$0xff]   ;;  %p1989_p10 = por %p1988_p0, %p1987_p13 }
  0x66   : > { %1661 = vmatprep.subr.bf16.mxu1 %v1853_v9  ;;  %v2339_v39 = vld [vmem:[%s2436_s5] ss:$0 sm:$0xff] }
  0x67   : > { %p1990_p3 = pnand %p1989_p10, %p1983_p12 }
  0x68   : > { %1638 = vmatpush3.bf16.msra.mxu0 %v1852_v8  ;;  %v1882_v8 = vld [vmem:[#allocation7 + $0x48] sm:$0xff]  }
  0x69   : > { %1662 = vmatpush3.bf16.msra.mxu1 %v1853_v9  ;;  %1639 = vmatprep.subr.bf16.mxu0 %v1854_v10  ;;  %v1883_v9 = vld [vmem:[#allocation7 + $0x18] sm:$0xff]  }
  0x6a   : > { %1663 = vmatprep.subr.bf16.mxu1 %v1855_v13 }
  0x6c   : > { %1640 = vmatpush3.bf16.msra.mxu0 %v1854_v10  ;;  %v1884_v10 = vld [vmem:[#allocation7 + $0x40] sm:$0xff]  }
  0x6d   : > { %1664 = vmatpush3.bf16.msra.mxu1 %v1855_v13  ;;  %1641 = vmatprep.subr.bf16.mxu0 %v1856_v17  ;;  %v1885_v13 = vld [vmem:[#allocation7 + $0x10] sm:$0xff]  }
  0x6e   : > { %1665 = vmatprep.subr.bf16.mxu1 %v1857_v18 }
  0x70   : > { %1642 = vmatpush3.bf16.msra.mxu0 %v1856_v17 }
  0x71   : > { %1666 = vmatpush3.bf16.msra.mxu1 %v1857_v18  ;;  %1643 = vmatprep.subr.bf16.mxu0 %v1858_v27 }
  0x72   : > { %1667 = vmatprep.subr.bf16.mxu1 %v1859_v28 }
  0x74   : > { %1644 = vmatpush3.bf16.msra.mxu0 %v1858_v27 }
  0x75   : > { %1668 = vmatpush3.bf16.msra.mxu1 %v1859_v28  ;;  %1677 = vmatprep.subr.bf16.mxu0 %v1862_v37 }
  0x76   : > { %1701 = vmatprep.subr.bf16.mxu1 %v1872_v62 }
  0x77   : > { %1646 = vmatmul.mubr.bf16.vlgmr.msra.gmra.mxu0 %v2252_v12 }
  0x78   : > { %1670 = vmatmul.mubr.bf16.vlgmr.msra.gmra.mxu1 %v394_v43  ;;  %1678 = vmatpush3.bf16.msra.mxu0 %v1862_v37 }
  0x79   : > { %1679 = vmatprep.subr.bf16.mxu0 %v1863_v41  ;;  %1649 = vmatprep.mubr.bf16.mxu0 %v2266_v23 }
  0x7a   : > { %1673 = vmatprep.mubr.bf16.mxu1 %v395_v45  ;;  %1702 = vmatpush3.bf16.msra.mxu1 %v1872_v62 }
  0x7b   : > { %1703 = vmatprep.subr.bf16.mxu1 %v1873_v63 }
  0x7c   : > { %1680 = vmatpush3.bf16.msra.mxu0 %v1863_v41 }
  0x7d   : > { %1681 = vmatprep.subr.bf16.mxu0 %v1864_v47 }
  0x7e   : > { %1704 = vmatpush3.bf16.msra.mxu1 %v1873_v63 }
  0x7f   : > { %1650 = vmatmul.mubr.bf16.gmra.mxu0 %v2269_v25  ;;  %1705 = vmatprep.subr.bf16.mxu1 %v1874_v0 }
  0x80   : > { %1682 = vmatpush3.bf16.msra.mxu0 %v1864_v47  ;;  %1674 = vmatmul.mubr.bf16.gmra.mxu1 %v396_v46 }
  0x81   : > { %1683 = vmatprep.subr.bf16.mxu0 %v1865_v48  ;;  %1693 = vmatprep.mubr.bf16.mxu0 %v412_v44  ;;  %v1520_v44 = vld [vmem:[%s2435_s4] ss:$0 sm:$0xff] }
  0x82   : > { %1706 = vmatpush3.bf16.msra.mxu1 %v1874_v0 }
  0x83   : > { %1707 = vmatprep.subr.bf16.mxu1 %v1876_v2 }
  0x84   : > { %1684 = vmatpush3.bf16.msra.mxu0 %v1865_v48 }
  0x85   : > { %1685 = vmatprep.subr.bf16.mxu0 %v1866_v49 }
  0x86   : > { %1708 = vmatpush3.bf16.msra.mxu1 %v1876_v2 }
  0x87   : > { %1709 = vmatprep.subr.bf16.mxu1 %v1878_v4 }
  0x88   : > { %1686 = vmatpush3.bf16.msra.mxu0 %v1866_v49 }
  0x89   : > { %1687 = vmatprep.subr.bf16.mxu0 %v1869_v50 }
  0x8a   : > { %1710 = vmatpush3.bf16.msra.mxu1 %v1878_v4 }
  0x8b   : > { %1711 = vmatprep.subr.bf16.mxu1 %v1880_v6 }
  0x8c   : > { %1688 = vmatpush3.bf16.msra.mxu0 %v1869_v50 }
  0x8d   : > { %1689 = vmatprep.subr.bf16.mxu0 %v1870_v51 }
  0x8e   : > { %1712 = vmatpush3.bf16.msra.mxu1 %v1880_v6 }
  0x8f   : > { %1713 = vmatprep.subr.bf16.mxu1 %v1882_v8 }
  0x90   : > { %1690 = vmatpush3.bf16.msra.mxu0 %v1870_v51 }
  0x91   : > { %1691 = vmatprep.subr.bf16.mxu0 %v1871_v53 }
  0x92   : > { %1714 = vmatpush3.bf16.msra.mxu1 %v1882_v8 }
  0x93   : > { %1715 = vmatprep.subr.bf16.mxu1 %v1884_v10 }
  0x94   : > { %1692 = vmatpush3.bf16.msra.mxu0 %v1871_v53 }
  0x95   : > { %1725 = vmatprep.subr.bf16.mxu0 %v1875_v1 }
  0x96   : > { %1716 = vmatpush3.bf16.msra.mxu1 %v1884_v10 }
  0x97   : > { %1694 = vmatmul.mubr.bf16.vlgmr.msra.gmra.mxu0 %v413_v57  ;;  %1749 = vmatprep.subr.bf16.mxu1 %v2301_v15 }
  0x98   : > { %1697 = vmatprep.mubr.bf16.mxu0 %v414_v59  ;;  %1726 = vmatpush3.bf16.msra.mxu0 %v1875_v1 }
  0x99   : > { %1727 = vmatprep.subr.bf16.mxu0 %v1877_v3 }
  0x9c   : > { %1728 = vmatpush3.bf16.msra.mxu0 %v1877_v3 }
  0x9d   : > { %1729 = vmatprep.subr.bf16.mxu0 %v1879_v5 }
  0x9f   : > { %1698 = vmatmul.mubr.bf16.gmra.mxu0 %v415_v61 }
  0xa0   : > { %1730 = vmatpush3.bf16.msra.mxu0 %v1879_v5 }
  0xa1   : > { %1731 = vmatprep.subr.bf16.mxu0 %v1881_v7 }
  0xa4   : > { %1732 = vmatpush3.bf16.msra.mxu0 %v1881_v7 }
  0xa5   : > { %1733 = vmatprep.subr.bf16.mxu0 %v1883_v9 }
  0xa8   : > { %1734 = vmatpush3.bf16.msra.mxu0 %v1883_v9 }
  0xa9   : > { %1735 = vmatprep.subr.bf16.mxu0 %v1885_v13 }
  0xac   : > { %1736 = vmatpush3.bf16.msra.mxu0 %v1885_v13 }
  0xad   : > { %1737 = vmatprep.subr.bf16.mxu0 %v1886_v14 }
  0xb0   : > { %1738 = vmatpush3.bf16.msra.mxu0 %v1886_v14 }
  0xb1   : > { %1739 = vmatprep.subr.bf16.mxu0 %v1888_v16 }
  0xb4   : > { %1740 = vmatpush3.bf16.msra.mxu0 %v1888_v16 }
 0x137   : > { %v1647_v17 = vpop.f32.mrf.mxu0 }
 0x138   : > { %v1671_v21 = vpop.f32.mrf.mxu1 }
 0x139   : > { %v535_v18 = vpop.f32.mrf.mxu0  ;;  %v657_v33 = vadd.f32 %v1671_v21, %v1647_v17 }
 0x13a   : > { %v648_v26 = vpop.f32.mrf.mxu1 }
 0x13b   : > { %v1648_v19 = vpop.f32.mrf.mxu0  ;;  %v649_v36 = vadd.f32 %v648_v26, %v535_v18  ;;  %v1889_v26 = vld [vmem:[#allocation7 + $0xb0] sm:$0xff]  }
 0x13c   : > { %v1672_v28 = vpop.f32.mrf.mxu1 }
 0x13d   : > { %v538_v22 = vpop.f32.mrf.mxu0  ;;  %v660_v41 = vadd.f32 %v1672_v28, %v1648_v19 }
 0x13e   : > { %v651_v30 = vpop.f32.mrf.mxu1 }
 0x13f   : > { %v1651_v24 = vpop.f32.mrf.mxu0  ;;  %v652_v46 = vadd.f32 %v651_v30, %v538_v22 }
 0x140   : > { %v1675_v31 = vpop.f32.mrf.mxu1 }
 0x141   : > { %v551_v27 = vpop.f32.mrf.mxu0  ;;  %v673_v51 = vadd.f32 %v1675_v31, %v1651_v24 }
 0x142   : > { %v664_v38 = vpop.f32.mrf.mxu1 }
 0x143   : > { %v1652_v29 = vpop.f32.mrf.mxu0  ;;  %v665_v56 = vadd.f32 %v664_v38, %v551_v27 }
 0x144   : > { %v1676_v48 = vpop.f32.mrf.mxu1 }
 0x145   : > { %v554_v32 = vpop.f32.mrf.mxu0  ;;  %v676_v3 = vadd.f32 %v1676_v48, %v1652_v29  ;;  %v1891_v48 = vld [vmem:[#allocation7 + $0xa0] sm:$0xff]  }
 0x146   : > { %v667_v60 = vpop.f32.mrf.mxu1 }
 0x147   : > { %v668_v6 = vadd.f32 %v667_v60, %v554_v32  ;;  %v1893_v60 = vld [vmem:[#allocation7 + $0x90] sm:$0xff]  }
 0x157   : > { %v1695_v34 = vpop.f32.mrf.mxu0 }
 0x158   : > { %v811_v37 = vadd.f32 %v1695_v34, %v657_v33 }
 0x159   : > { %v778_v40 = vpop.f32.mrf.mxu0 }
 0x15a   : > { %v826_v42 = vmul.f32 %v1519_v35, %v811_v37  ;;  %v809_v43 = vadd.f32 %v778_v40, %v649_v36 }
 0x15b   : > { %v1696_v45 = vpop.f32.mrf.mxu0 }
 0x15c   : > { %v812_v47 = vadd.f32 %v1696_v45, %v660_v41  ;;  %v824_v49 = vmul.f32 %v1519_v35, %v809_v43  ;;  %v841_v52 = vadd.f32 %v1520_v44, %v826_v42  ;;  %v1890_v42 = vld [vmem:[#allocation7 + $0xa8] sm:$0xff]  }
 0x15d   : > { %v781_v50 = vpop.f32.mrf.mxu0 }
 0x15e   : > { %v827_v53 = vmul.f32 %v1519_v35, %v812_v47  ;;  %v810_v54 = vadd.f32 %v781_v50, %v652_v46  ;;  %v839_v61 = vadd.f32 %v1520_v44, %v824_v49  ;;  %v849_v63 = vmax.f32 %v841_v52, 0.0 }
 0x15f   : > { %v1699_v55 = vpop.f32.mrf.mxu0 }
 0x160   : > { %v842_v57 = vadd.f32 %v1520_v44, %v827_v53  ;;  %v825_v58 = vmul.f32 %v1519_v35, %v810_v54  ;;  %v815_v59 = vadd.f32 %v1699_v55, %v673_v51  ;;  %v847_v10 = vmax.f32 %v839_v61, 0.0  ;;  %v1894_v61 = vld [vmem:[#allocation7 + $0x88] sm:$0xff]  }
 0x161   : > { %v794_v62 = vpop.f32.mrf.mxu0 }
 0x162   : > { %v850_v0 = vmax.f32 %v842_v57, 0.0  ;;  %v840_v1 = vadd.f32 %v1520_v44, %v825_v58  ;;  %v813_v2 = vadd.f32 %v794_v62, %v665_v56  ;;  %v830_v4 = vmul.f32 %v1519_v35, %v815_v59  ;;  %v1892_v57 = vld [vmem:[#allocation7 + $0x98] sm:$0xff]   ;;  %v1895_v62 = vld [vmem:[#allocation7 + $0x80] sm:$0xff]  }
 0x163   : > { %v1700_v5 = vpop.f32.mrf.mxu0 }
 0x164   : > { %v2310_v7 = vpack.c.bf16 %v850_v0, %v849_v63  ;;  %v848_v8 = vmax.f32 %v840_v1, 0.0  ;;  %v828_v9 = vmul.f32 %v1519_v35, %v813_v2  ;;  %v816_v13 = vadd.f32 %v1700_v5, %v676_v3 }
 0x165   : > { %v797_v14 = vpop.f32.mrf.mxu0  ;;  %v845_v18 = vadd.f32 %v1520_v44, %v830_v4 }
 0x166   : > { %v867_v16 = vshrl.u32 %v2310_v7, 16  ;;  %v814_v17 = vadd.f32 %v797_v14, %v668_v6  ;;  %v831_v19 = vmul.f32 %v1519_v35, %v816_v13  ;;  %v855_v21 = vpack.c.bf16 %v848_v8, %v847_v10 }
 0x167   : > { %v843_v22 = vadd.f32 %v1520_v44, %v828_v9  ;;  %v870_v32 = vshll.u32 %v2310_v7, 16  ;;  %v853_v33 = vmax.f32 %v845_v18, 0.0 }
 0x168   : > { %v829_v24 = vmul.f32 %v1519_v35, %v814_v17  ;;  %v869_v27 = vrot.slane %v867_v16, 7  ;;  %v846_v28 = vadd.f32 %v1520_v44, %v831_v19  ;;  %1717 = vmatprep.mubr.bf16.mxu1 %v855_v21  ;;  %v860_v29 = vshrl.u32 %v855_v21, 16 }
 0x169   : > { %v863_v30 = vshll.u32 %v855_v21, 16  ;;  %1718 = vmatmul.mubr.bf16.vlgmr.msra.gmra.mxu1 %v2310_v7  ;;  %v851_v35 = vmax.f32 %v843_v22, 0.0  ;;  %v897_v63 = vrot.slane %v870_v32, 1 }
 0x16a   : > { %v844_v31 = vadd.f32 %v1520_v44, %v829_v24  ;;  %v854_v34 = vmax.f32 %v846_v28, 0.0  ;;  %1750 = vmatpush3.bf16.msra.mxu1 %v2301_v15  ;;  %v862_v36 = vrot.slane %v860_v29, 7  ;;  %v872_v40 = vor.u32 %v870_v32, %v869_v27 }
 0x16b   : > { %v895_v37 = vrot.slane %v863_v30, 1  ;;  %1751 = vmatprep.subr.bf16.mxu1 %v1889_v26  ;;  %v898_v1 = vor.u32 %v897_v63, %v867_v16 }
 0x16c   : > { %v852_v38 = vmax.f32 %v844_v31, 0.0  ;;  %v865_v41 = vor.u32 %v863_v30, %v862_v36  ;;  %v858_v43 = vpack.c.bf16 %v854_v34, %v853_v33  ;;  %v892_v15 = vsel %vm2258_vm2, 0, %v872_v40  ;;  %v2344_v31 = vld [vmem:[%s2437_s6] ss:$0 sm:$0xff] }
 0x16d   : > { %v896_v46 = vor.u32 %v895_v37, %v860_v29  ;;  %v908_v20 = vsel %vm2278_vm5, %v898_v1, 0  ;;  %v1340_v33 = vunpack.c.l.bf16 %v2252_v12  ;;  %v1344_v1 = vunpack.c.l.bf16 %v2269_v25 }
 0x16e   : > { %v857_v45 = vpack.c.bf16 %v852_v38, %v851_v35  ;;  %1752 = vmatpush3.bf16.msra.mxu1 %v1889_v26  ;;  %v891_v44 = vsel %vm2258_vm2, 0, %v865_v41  ;;  %v881_v47 = vshrl.u32 %v858_v43, 16  ;;  %v884_v54 = vshll.u32 %v858_v43, 16 }
 0x16f   : > { %1741 = vmatprep.mubr.bf16.mxu0 %v891_v44  ;;  %1753 = vmatprep.subr.bf16.mxu1 %v1890_v42  ;;  %v907_v51 = vsel %vm2278_vm5, %v896_v46, 0  ;;  %v1338_v35 = vunpack.c.l.bf16 %v2249_v11  ;;  %v1341_v46 = vunpack.c.h.bf16 %v2252_v12 }
 0x170   : > { %1721 = vmatprep.mubr.bf16.mxu1 %v857_v45  ;;  %v874_v49 = vshrl.u32 %v857_v45, 16  ;;  %1742 = vmatmul.mubr.bf16.vlgmr.msra.gmra.mxu0 %v892_v15  ;;  %v883_v50 = vrot.slane %v881_v47, 7  ;;  %v877_v53 = vshll.u32 %v857_v45, 16  ;;  %v901_v3 = vrot.slane %v884_v54, 1 }
 0x171   : > { %1722 = vmatmul.mubr.bf16.gmra.mxu1 %v858_v43 }
 0x172   : > { %v876_v52 = vrot.slane %v874_v49, 7  ;;  %1754 = vmatpush3.bf16.msra.mxu1 %v1890_v42  ;;  %1765 = vmatprep.mubr.bf16.mxu1 %v907_v51  ;;  %v886_v56 = vor.u32 %v884_v54, %v883_v50  ;;  %v899_v0 = vrot.slane %v877_v53, 1  ;;  %v902_v5 = vor.u32 %v901_v3, %v881_v47 }
 0x173   : > { %1755 = vmatprep.subr.bf16.mxu1 %v1891_v48  ;;  %v1339_v50 = vunpack.c.h.bf16 %v2249_v11 }
 0x174   : > { %v879_v55 = vor.u32 %v877_v53, %v876_v52  ;;  %v894_v59 = vsel %vm2258_vm2, 0, %v886_v56  ;;  %v900_v2 = vor.u32 %v899_v0, %v874_v49  ;;  %v910_v6 = vsel %vm2278_vm5, %v902_v5, 0 }
 0x175   : > { %v1342_v0 = vunpack.c.l.bf16 %v2266_v23 }
 0x176   : > { %v893_v58 = vsel %vm2258_vm2, 0, %v879_v55  ;;  %1756 = vmatpush3.bf16.msra.mxu1 %v1891_v48  ;;  %v909_v4 = vsel %vm2278_vm5, %v900_v2, 0 }
 0x177   : > { %1745 = vmatprep.mubr.bf16.mxu0 %v893_v58  ;;  %1757 = vmatprep.subr.bf16.mxu1 %v1892_v57 }
 0x178   : > { %1746 = vmatmul.mubr.bf16.gmra.mxu0 %v894_v59 }
 0x17a   : > { %1758 = vmatpush3.bf16.msra.mxu1 %v1892_v57 }
 0x17b   : > { %1759 = vmatprep.subr.bf16.mxu1 %v1893_v60 }
 0x17e   : > { %1760 = vmatpush3.bf16.msra.mxu1 %v1893_v60 }
 0x17f   : > { %1761 = vmatprep.subr.bf16.mxu1 %v1894_v61 }
 0x182   : > { %1762 = vmatpush3.bf16.msra.mxu1 %v1894_v61 }
 0x183   : > { %1763 = vmatprep.subr.bf16.mxu1 %v1895_v62 }
 0x186   : > { %1764 = vmatpush3.bf16.msra.mxu1 %v1895_v62 }
 0x189   : > { %1766 = vmatmul.mubr.bf16.vlgmr.msra.gmra.mxu1 %v908_v20 }
 0x18a   : > { %1769 = vmatprep.mubr.bf16.mxu1 %v909_v4 }
 0x191   : > { %1770 = vmatmul.mubr.bf16.gmra.mxu1 %v910_v6 }
 0x229   : > { %v1719_v8 = vpop.f32.mrf.mxu1 }
 0x22b   : > { %v1026_v9 = vpop.f32.mrf.mxu1 }
 0x22d   : > { %v1720_v7 = vpop.f32.mrf.mxu1 }
 0x22f   : > { %v1029_v13 = vpop.f32.mrf.mxu1 }
 0x230   : > { %v1743_v10 = vpop.f32.mrf.mxu0 }
 0x231   : > { %v1723_v16 = vpop.f32.mrf.mxu1  ;;  %v1148_v26 = vadd.f32 %v1743_v10, %v1719_v8 }
 0x232   : > { %v1139_v14 = vpop.f32.mrf.mxu0 }
 0x233   : > { %v1042_v18 = vpop.f32.mrf.mxu1  ;;  %v1140_v28 = vadd.f32 %v1139_v14, %v1026_v9  ;;  %v1345_v9 = vunpack.c.h.bf16 %v2269_v25 }
 0x234   : > { %v1744_v17 = vpop.f32.mrf.mxu0 }
 0x235   : > { %v1724_v21 = vpop.f32.mrf.mxu1  ;;  %v1151_v34 = vadd.f32 %v1744_v17, %v1720_v7 }
 0x236   : > { %v1142_v19 = vpop.f32.mrf.mxu0 }
 0x237   : > { %v1045_v24 = vpop.f32.mrf.mxu1  ;;  %v1143_v40 = vadd.f32 %v1142_v19, %v1029_v13  ;;  %v1343_v19 = vunpack.c.h.bf16 %v2266_v23 }
 0x238   : > { %v1747_v22 = vpop.f32.mrf.mxu0 }
 0x239   : > { %v1164_v51 = vadd.f32 %v1747_v22, %v1723_v16 }
 0x23a   : > { %v1155_v29 = vpop.f32.mrf.mxu0 }
 0x23b   : > { %v1156_v52 = vadd.f32 %v1155_v29, %v1042_v18 }
 0x23c   : > { %v1748_v41 = vpop.f32.mrf.mxu0 }
 0x23d   : > { %v1167_v12 = vadd.f32 %v1748_v41, %v1724_v21 }
 0x23e   : > { %v1158_v54 = vpop.f32.mrf.mxu0 }
 0x23f   : > { %v1159_v2 = vadd.f32 %v1158_v54, %v1045_v24 }
 0x249   : > { %v1767_v27 = vpop.f32.mrf.mxu1 }
 0x24a   : > { %v1302_v30 = vadd.f32 %v1767_v27, %v1148_v26 }
 0x24b   : > { %v1269_v32 = vpop.f32.mrf.mxu1 }
 0x24c   : > { %v1317_v36 = vmul.f32 %v2339_v39, %v1302_v30  ;;  %v1300_v37 = vadd.f32 %v1269_v32, %v1140_v28 }
 0x24d   : > { %v1768_v38 = vpop.f32.mrf.mxu1 }
 0x24e   : > { %v1332_v42 = vadd.f32 %v2344_v31, %v1317_v36  ;;  %v1315_v43 = vmul.f32 %v2339_v39, %v1300_v37  ;;  %v1303_v45 = vadd.f32 %v1768_v38, %v1151_v34 }
 0x24f   : > { %v1272_v44 = vpop.f32.mrf.mxu1 }
 0x250   : > { %v1348_v47 = vadd.f32 %v1340_v33, %v1332_v42  ;;  %v1330_v15 = vadd.f32 %v2344_v31, %v1315_v43  ;;  %v1318_v48 = vmul.f32 %v2339_v39, %v1303_v45  ;;  %v1301_v49 = vadd.f32 %v1272_v44, %v1143_v40 }
 0x251   : > { %v1771_v53 = vpop.f32.mrf.mxu1 }
 0x252   : > { %v1356_v55 = vmax.f32 %v1348_v47, 0.0  ;;  %v1346_v56 = vadd.f32 %v1338_v35, %v1330_v15  ;;  %v1333_v57 = vadd.f32 %v2344_v31, %v1318_v48  ;;  %v1316_v58 = vmul.f32 %v2339_v39, %v1301_v49 }
 0x253   : > { %v1306_v59 = vadd.f32 %v1771_v53, %v1164_v51  ;;  %v1285_v60 = vpop.f32.mrf.mxu1 }
 0x254   : > { %1364 = vst [vmem:[%s2358_s16 + $0x10] sm:$0xff] %v1356_v55  ;;  %v1354_v61 = vmax.f32 %v1346_v56, 0.0  ;;  %v1349_v11 = vadd.f32 %v1341_v46, %v1333_v57  ;;  %v1331_v62 = vadd.f32 %v2344_v31, %v1316_v58  ;;  %v1304_v63 = vadd.f32 %v1285_v60, %v1156_v52 }
 0x255   : > { %v1321_v20 = vmul.f32 %v2339_v39, %v1306_v59  ;;  %v1772_v3 = vpop.f32.mrf.mxu1 }
 0x256   : > { %1362 = vst [vmem:[%s2358_s16] sm:$0xff] %v1354_v61  ;;  %v1357_v4 = vmax.f32 %v1349_v11, 0.0  ;;  %v1347_v5 = vadd.f32 %v1339_v50, %v1331_v62  ;;  %v1319_v6 = vmul.f32 %v2339_v39, %v1304_v63  ;;  %v1307_v8 = vadd.f32 %v1772_v3, %v1167_v12 }
 0x257   : > { %v1336_v7 = vadd.f32 %v2344_v31, %v1321_v20  ;;  %v1288_v10 = vpop.f32.mrf.mxu1 }
 0x258   : > { %1365 = vst [vmem:[%s2358_s16 + $0x18] sm:$0xff] %v1357_v4  ;;  %v1355_v13 = vmax.f32 %v1347_v5, 0.0  ;;  %v1334_v14 = vadd.f32 %v2344_v31, %v1319_v6  ;;  %v1322_v16 = vmul.f32 %v2339_v39, %v1307_v8  ;;  %v1305_v17 = vadd.f32 %v1288_v10, %v1159_v2 }
 0x259   : > { %v1352_v18 = vadd.f32 %v1344_v1, %v1336_v7 }
 0x25a   : > { %1363 = vst [vmem:[%s2358_s16 + $0x8] sm:$0xff] %v1355_v13  ;;  %v1350_v25 = vadd.f32 %v1342_v0, %v1334_v14  ;;  %v1337_v21 = vadd.f32 %v2344_v31, %v1322_v16  ;;  %v1320_v22 = vmul.f32 %v2339_v39, %v1305_v17 }
 0x25b   : > { %v1360_v24 = vmax.f32 %v1352_v18, 0.0 }
 0x25c   : > { %v1358_v26 = vmax.f32 %v1350_v25, 0.0  ;;  %v1353_v27 = vadd.f32 %v1345_v9, %v1337_v21  ;;  %v1335_v28 = vadd.f32 %v2344_v31, %v1320_v22 }
 0x25d   : > { %1368 = vst [vmem:[%s2358_s16 + $0x30] sm:$0xff] %v1360_v24 }
 0x25e   : > { %1366 = vst [vmem:[%s2358_s16 + $0x20] sm:$0xff] %v1358_v26  ;;  %v1361_v23 = vmax.f32 %v1353_v27, 0.0  ;;  %v1351_v29 = vadd.f32 %v1343_v19, %v1335_v28 }
 0x260   : > { %1369 = vst [vmem:[%s2358_s16 + $0x38] sm:$0xff] %v1361_v23  ;;  %v1359_v39 = vmax.f32 %v1351_v29, 0.0 }
 0x262   : > { %1367 = vst [vmem:[%s2358_s16 + $0x28] sm:$0xff] %v1359_v39 }
 0x263   : > { %1993 = shalt.err (!%p1990_p3)
}
 0x264   : > { %s1994_s29 = scalar_lea.hbm %s2384_s30, 1024  ;;  %s1998_s14 = scalar_lea.hbm %s2438_s7, 2048 }
 0x265   : > { %p1995_p11 = scmp.ne.s32.totalorder %s2384_s30, %s1994_s29  ;;  %p1999_p4 = scmp.lt.s32.totalorder %s2384_s30, %s2438_s7 }
 0x266   : > { %p2000_p6 = scmp.lt.s32.totalorder %s1998_s14, %s1994_s29 }
 0x267   : > { %p1996_p9 = pnand %p1995_p11, %p2463_p2 }
 0x268   : > { %p2001_p8 = por %p2000_p6, %p1999_p4 }
 0x269   : > { %p1997_p1 = pneg %p1996_p9 }
 0x26b   : > { %p2002_p5 = pnand %p2001_p8, %p1997_p1 }
 0x26d   : > { %2005 = shalt.err (!%p2002_p5)
}
 0x26e   : > { %s2056_s15 = smov 128   ;;  %s2057_s19 = smov 8  }
 0x26f   : > { %1783 = dma.vmem_to_hbm [thread:$0]  (%p2463_p2), %s2386_s1, 1024, %s2384_s30, %s1371_s9, %s2056_s15, %s2056_s15, %s2057_s19  }
 0x270 PF: > { %s1400_s28 = sand.u32 1, %s2036_s24   ;;  %p2464_p7 = scmp.ne.s32.totalorder %s2447_s8, 0 }
 0x271   : > { %p2465_p12 = scmp.ge.s32.totalorder %s2048_s27, 2  ;;  %s1401_s20 = scalar_lea.sflag [#allocation4], %s1400_s28 }
 0x273   : > { %p1797_p13 = pnand %p2465_p12, %p2464_p7 }
 0x275   : > { %p1798_p0 = pneg %p1797_p13 }
 0x277   : > { %2031 = dma.done.wait (%p1798_p0), %s1401_s20, 1024  }
 0x278   : > { %2033 = vsyncadd (%p1798_p0), %s1401_s20, 4294966272  ;;  %p21_p10 = scmp.ge.s32.totalorder %s2176_s23, 4   ;;  %s2466_s24 = smov %s2040_s25 }
 0x279   : > { %s2467_s25 = smov %s2044_s26  ;;  %s2468_s26 = smov %s2192_s12 }
 0x27a   : > { %s2469_s27 = smov %s2176_s23  ;;  %23 = sbr.rel (!%p21_p10) target bundleno = 8 (0x8), region = 105 }
 0x27f   :  { %1406 = vsyncpa [#allocation3], 1 }
 0x280   :  { %1408 = vsyncpa [#allocation3 + $0x1], 1 }
 0x281   :  { %1409 = vsyncpa [#allocation6], 1 }
 0x282   :  { %1410 = vsyncpa [#allocation4], 1 }
 0x283   :  { %1412 = vsyncpa [#allocation4 + $0x1], 1 }

</bundles_post_ra>
